<compile_context>
chip_gen: v5e
topology: v5e:2x2
jax: 0.10.0
libtpu: 0.0.40
codegen_flags: <defaults>
</compile_context>

<pallas_src>
import functools

import jax
import jax.numpy as jnp
from jax.experimental import pallas as pl
from jax.experimental.pallas import tpu as pltpu


def _round_up(x, m):
    return ((x + m - 1) // m) * m


_LANE_TARGET = 1024                 # max lanes per block when packing small-W images
_BLOCK_ELEMS_TARGET = 512 * 1024    # ~2 MiB f32 per input block:
                                    # 2 inputs x 2 pipeline bufs + 1 acc ~= 10 MiB


def _adjust_loss_kernel(low_ref, high_ref, out_ref, acc_ref, *, ratio, inv_sq):
    """Processes one (TR, C_pad) row-tile of the packed, zero-padded slabs."""
    step = pl.program_id(0)
    low = low_ref[...]
    high = high_ref[...]

    # mean((low - high)^2) term (pure VPU).
    d = low - high

    # gradient2-style |d/dx|, |d/dy| via XLU rolls.  Every image is followed by a
    # zero row and a zero column, and every tile ends on zero rows / the slab ends
    # on zero columns, so every roll-wrap and inter-image seam difference is
    # exactly zero in BOTH inputs: no masks needed.
    gx_l = jnp.abs(low - pltpu.roll(low, shift=1, axis=1))
    gx_h = jnp.abs(high - pltpu.roll(high, shift=1, axis=1))
    gy_l = jnp.abs(low - pltpu.roll(low, shift=1, axis=0))
    gy_h = jnp.abs(high - pltpu.roll(high, shift=1, axis=0))
    dx = gx_l - gx_h
    dy = gy_l - gy_h

    # Merged accumulator: sq-term + (inv_grad/inv_sq) * grad-term.
    contrib = d * d + ratio * (dx * dx + dy * dy)

    @pl.when(step == 0)
    def _first():                 # overwrite on step 0 -> no separate zero memset
        acc_ref[...] = contrib

    @pl.when(step != 0)
    def _rest():
        acc_ref[...] += contrib

    # Finalize: one cross-lane/sublane reduction + one scale.
    @pl.when(step == pl.num_programs(0) - 1)
    def _finalize():
        out_ref[0, 0] = jnp.sum(acc_ref[...]) * inv_sq


@jax.jit
def adjust_loss_pallas(output_i, input_high_i):
    """output_i, input_high_i: (N, 1, H, W) float32 (NCHW). Returns scalar loss."""
    n, c, h, w = output_i.shape
    assert c == 1, "gradient2's (1,1,2,2) conv kernel implies a single channel"
    n_img = n
    row_pitch = h + 1            # H data rows + one shared trailing zero row
    col_pitch = w + 1            # W data cols + one shared trailing zero col

    # ---- lane packing: only pack images side-by-side along lanes when W is small
    # (lane-dense images skip the materialized host-side transpose entirely).
    if col_pitch >= 128 or n_img == 1:
        n_c = 1
    else:
        max_nc = max(1, min(n_img, _LANE_TARGET // col_pitch))
        n_c, best_eff = 1, 0.0
        for cand in range(1, max_nc + 1):
            eff = (cand * col_pitch) / _round_up(cand * col_pitch, 128)
            if eff >= best_eff:
                n_c, best_eff = cand, eff
    c_slab = n_c * col_pitch
    c_pad = _round_up(c_slab, 128)

    # ---- images stacked per tile along sublanes with shared separators; only the
    # tile (not each image) is rounded to a multiple of 8 rows.
    rows_budget = max(8, _BLOCK_ELEMS_TARGET // c_pad)
    g_fit = max(1, rows_budget // row_pitch)
    g_hi = max(1, min(g_fit, -(-n_img // n_c)))
    best = None
    for cand in range(1, g_hi + 1):
        tr_c = _round_up(cand * row_pitch, 8)
        nt_c = -(-n_img // (n_c * cand))
        key = (nt_c * tr_c, -cand)       # minimize streamed rows; prefer fewer steps
        if best is None or key < best[0]:
            best = (key, cand, tr_c, nt_c)
    _, g, tr, n_tiles = best
    cap = n_tiles * n_c * g              # image capacity (extras are all-zero)
    # TODO(synk): a single image larger than the block budget would need an
    #             intra-image row split with a 1-row halo; not implemented here.

    def prep(x):
        x = x.reshape(n_img, h, w).astype(jnp.float32)
        if n_c == 1:
            # No transpose: vertical stacking, shared zero separator rows.
            x = jnp.pad(x, ((0, cap - n_img), (0, 1), (0, c_pad - w)))
            x = x.reshape(n_tiles, g * row_pitch, c_pad)
        else:
            # Small W: pack n_c images along lanes for lane density (the transpose
            # is materialized, but only on this path where it pays off).
            x = jnp.pad(x, ((0, cap - n_img), (0, 1), (0, 1)))
            x = x.reshape(n_tiles, g, n_c, row_pitch, col_pitch)
            x = jnp.transpose(x, (0, 1, 3, 2, 4))
            x = x.reshape(n_tiles, g * row_pitch, c_slab)
            x = jnp.pad(x, ((0, 0), (0, 0), (0, c_pad - c_slab)))
        x = jnp.pad(x, ((0, 0), (0, tr - g * row_pitch), (0, 0)))
        return x.reshape(n_tiles * tr, c_pad)

    low = prep(output_i)
    high = prep(input_high_i)

    inv_sq = 1.0 / float(n * h * w)
    inv_grad = 1.0 / float(n * (h + 1) * (w + 1))
    ratio = inv_grad / inv_sq
    kernel = functools.partial(_adjust_loss_kernel, ratio=ratio, inv_sq=inv_sq)

    block_bytes = tr * c_pad * 4
    vmem_need = 5 * block_bytes + (2 << 20)   # 2 in x 2 bufs + acc + slack
    cp_kwargs = dict(dimension_semantics=("arbitrary",))
    if vmem_need > (16 << 20):                # only raise past the smallest default
        cp_kwargs["vmem_limit_bytes"] = min(vmem_need, 64 << 20)

    out = pl.pallas_call(
        kernel,
        out_shape=jax.ShapeDtypeStruct((1, 1), jnp.float32),
        grid_spec=pltpu.PrefetchScalarGridSpec(
            num_scalar_prefetch=0,
            grid=(n_tiles,),
            in_specs=[
                pl.BlockSpec((tr, c_pad), lambda i: (i, 0)),
                pl.BlockSpec((tr, c_pad), lambda i: (i, 0)),
            ],
            out_specs=pl.BlockSpec((1, 1), lambda i: (0, 0),
                                   memory_space=pltpu.MemorySpace.SMEM),
            scratch_shapes=[pltpu.VMEM((tr, c_pad), jnp.float32)],
        ),
        compiler_params=pltpu.CompilerParams(**cp_kwargs),
        cost_estimate=pl.CostEstimate(
            flops=17 * n_tiles * tr * c_pad,
            transcendentals=0,
            bytes_accessed=2 * n_tiles * tr * c_pad * 4 + 4),
    )(low, high)
    return out[0, 0]


# ---------------- pure-JAX reference (mirrors the PyTorch code) ----------------
def _gradient2_ref(x, direction):
    kx = jnp.array([[0.0, 0.0], [-1.0, 1.0]], jnp.float32).reshape(1, 1, 2, 2)
    ky = jnp.transpose(kx, (0, 1, 3, 2))
    k = kx if direction == "x" else ky
    y = jax.lax.conv_general_dilated(
        x, k, window_strides=(1, 1), padding=[(1, 1), (1, 1)],
        dimension_numbers=("NCHW", "OIHW", "NCHW"))
    return jnp.abs(y)


def adjust_loss_ref(output_i, input_high_i):
    xl = (_gradient2_ref(output_i, "x") - _gradient2_ref(input_high_i, "x")) ** 2
    yl = (_gradient2_ref(output_i, "y") - _gradient2_ref(input_high_i, "y")) ** 2
    loss_grad = jnp.mean(xl + yl)
    loss_sq = jnp.mean((output_i - input_high_i) ** 2)
    return loss_sq + loss_grad


if __name__ == "__main__":
    key = jax.random.PRNGKey(0)
    k1, k2 = jax.random.split(key)
    N, C, H, W = 2, 1, 16, 16
    output_i = jax.random.uniform(k1, (N, C, H, W), dtype=jnp.float32)
    input_high_i = jax.random.uniform(k2, (N, C, H, W), dtype=jnp.float32)

    loss = adjust_loss_pallas(output_i, input_high_i)
    loss = jax.block_until_ready(loss)

    ref = jax.block_until_ready(adjust_loss_ref(output_i, input_high_i))
    assert jnp.allclose(loss, ref, atol=1e-5, rtol=1e-5), (loss, ref)
    print("KERNEL_OK")
</pallas_src>

<mosaic_0001>
module attributes {stable_mosaic.version = 11 : i64} {
  func.func @_adjust_loss_kernel(%arg0: i32, %arg1: memref<24x128xf32, #tpu.memory_space<vmem>>, %arg2: memref<24x128xf32, #tpu.memory_space<vmem>>, %arg3: memref<1x1xf32, #tpu.memory_space<smem>>, %arg4: memref<24x128xf32, #tpu.memory_space<vmem>>) attributes {dimension_semantics = [#tpu.dimension_semantics<arbitrary>], iteration_bounds = array<i64: 1>, scalar_prefetch = 0 : i64, scratch_operands = 1 : i64, tpu.core_type = #tpu.core_type<tc>, window_params = [{transform_indices = @transform_0, window_bounds = array<i64: 24, 128>}, {transform_indices = @transform_1, window_bounds = array<i64: 24, 128>}, {transform_indices = @transform_2, window_bounds = array<i64: 1, 1>}]} {
    %c0 = arith.constant 0 : index
    %c0_0 = arith.constant 0 : index
    %0 = vector.load %arg1[%c0, %c0_0] : memref<24x128xf32, #tpu.memory_space<vmem>>, vector<24x128xf32>
    %c0_1 = arith.constant 0 : index
    %c0_2 = arith.constant 0 : index
    %1 = vector.load %arg2[%c0_1, %c0_2] : memref<24x128xf32, #tpu.memory_space<vmem>>, vector<24x128xf32>
    %2 = arith.subf %0, %1 : vector<24x128xf32>
    %c1_i32 = arith.constant 1 : i32
    %3 = tpu.dynamic_rotate %0 by %c1_i32 dim 1 : vector<24x128xf32>, i32 -> vector<24x128xf32>
    %4 = arith.subf %0, %3 : vector<24x128xf32>
    %5 = math.absf %4 : vector<24x128xf32>
    %c1_i32_3 = arith.constant 1 : i32
    %6 = tpu.dynamic_rotate %1 by %c1_i32_3 dim 1 : vector<24x128xf32>, i32 -> vector<24x128xf32>
    %7 = arith.subf %1, %6 : vector<24x128xf32>
    %8 = math.absf %7 : vector<24x128xf32>
    %c1_i32_4 = arith.constant 1 : i32
    %9 = tpu.dynamic_rotate %0 by %c1_i32_4 dim 0 : vector<24x128xf32>, i32 -> vector<24x128xf32>
    %10 = arith.subf %0, %9 : vector<24x128xf32>
    %11 = math.absf %10 : vector<24x128xf32>
    %c1_i32_5 = arith.constant 1 : i32
    %12 = tpu.dynamic_rotate %1 by %c1_i32_5 dim 0 : vector<24x128xf32>, i32 -> vector<24x128xf32>
    %13 = arith.subf %1, %12 : vector<24x128xf32>
    %14 = math.absf %13 : vector<24x128xf32>
    %15 = arith.subf %5, %8 : vector<24x128xf32>
    %16 = arith.subf %11, %14 : vector<24x128xf32>
    %17 = arith.mulf %2, %2 : vector<24x128xf32>
    %18 = arith.mulf %15, %15 : vector<24x128xf32>
    %19 = arith.mulf %16, %16 : vector<24x128xf32>
    %20 = arith.addf %18, %19 : vector<24x128xf32>
    %cst = arith.constant 0.885813176 : f32
    %21 = vector.broadcast %cst : f32 to vector<24x128xf32>
    %22 = arith.mulf %21, %20 : vector<24x128xf32>
    %23 = arith.addf %17, %22 : vector<24x128xf32>
    %c0_i32 = arith.constant 0 : i32
    %24 = arith.cmpi eq, %arg0, %c0_i32 : i32
    %25 = arith.extui %24 : i1 to i32
    %c0_i32_6 = arith.constant 0 : i32
    %26 = arith.cmpi ne, %25, %c0_i32_6 : i32
    scf.if %26 {
      %c0_11 = arith.constant 0 : index
      %c0_12 = arith.constant 0 : index
      %33 = vector.load %arg4[%c0_11, %c0_12] : memref<24x128xf32, #tpu.memory_space<vmem>>, vector<24x128xf32>
      tpu.vector_store %arg4[%c0_11, %c0_12], %23 {strides = array<i32>} : memref<24x128xf32, #tpu.memory_space<vmem>>, vector<24x128xf32>,
    } else {
    }
    %c0_i32_7 = arith.constant 0 : i32
    %27 = arith.cmpi ne, %arg0, %c0_i32_7 : i32
    %28 = arith.extui %27 : i1 to i32
    %c0_i32_8 = arith.constant 0 : i32
    %29 = arith.cmpi ne, %28, %c0_i32_8 : i32
    scf.if %29 {
      %c0_11 = arith.constant 0 : index
      %c0_12 = arith.constant 0 : index
      %33 = vector.load %arg4[%c0_11, %c0_12] : memref<24x128xf32, #tpu.memory_space<vmem>>, vector<24x128xf32>
      %34 = arith.addf %33, %23 : vector<24x128xf32>
      %c0_13 = arith.constant 0 : index
      %c0_14 = arith.constant 0 : index
      %35 = vector.load %arg4[%c0_13, %c0_14] : memref<24x128xf32, #tpu.memory_space<vmem>>, vector<24x128xf32>
      tpu.vector_store %arg4[%c0_13, %c0_14], %34 {strides = array<i32>} : memref<24x128xf32, #tpu.memory_space<vmem>>, vector<24x128xf32>,
    } else {
    }
    %c0_i32_9 = arith.constant 0 : i32
    %30 = arith.cmpi eq, %arg0, %c0_i32_9 : i32
    %31 = arith.extui %30 : i1 to i32
    %c0_i32_10 = arith.constant 0 : i32
    %32 = arith.cmpi ne, %31, %c0_i32_10 : i32
    scf.if %32 {
      %c0_11 = arith.constant 0 : index
      %c0_12 = arith.constant 0 : index
      %33 = vector.load %arg4[%c0_11, %c0_12] : memref<24x128xf32, #tpu.memory_space<vmem>>, vector<24x128xf32>
      %34 = vector.shape_cast %33 : vector<24x128xf32> to vector<1x24x128xf32>
      %cst_13 = arith.constant dense<0.000000e+00> : vector<1xf32>
      %35 = vector.multi_reduction <add>, %34, %cst_13 [1, 2] : vector<1x24x128xf32> to vector<1xf32>
      %36 = vector.shape_cast %35 : vector<1xf32> to vector<1x1x1xf32>
      %37 = vector.extract %36[0, 0, 0] : f32 from vector<1x1x1xf32>
      %cst_14 = arith.constant 0.001953125 : f32
      %38 = arith.mulf %37, %cst_14 : f32
      %c0_15 = arith.constant 0 : index
      %c0_16 = arith.constant 0 : index
      %39 = memref.load %arg3[%c0_15, %c0_16] : memref<1x1xf32, #tpu.memory_space<smem>>
      memref.store %38, %arg3[%c0_15, %c0_16] : memref<1x1xf32, #tpu.memory_space<smem>>
    } else {
    }
    return
  }
  func.func @transform_0(%arg0: i32) -> (i32, i32) {
    %c0_i32 = arith.constant 0 : i32
    %c0_i32_0 = arith.constant 0 : i32
    return %arg0, %c0_i32 : i32, i32
  }
  func.func @transform_1(%arg0: i32) -> (i32, i32) {
    %c0_i32 = arith.constant 0 : i32
    %c0_i32_0 = arith.constant 0 : i32
    return %arg0, %c0_i32 : i32, i32
  }
  func.func @transform_2(%arg0: i32) -> (i32, i32) {
    %c0_i32 = arith.constant 0 : i32
    %c0_i32_0 = arith.constant 0 : i32
    %c0_i32_1 = arith.constant 0 : i32
    return %c0_i32, %c0_i32_0 : i32, i32
  }
}

</mosaic_0001>

<bundles_post_ra>
// kernel: adjust_loss_pallas.1
= control target key start
LH: loop header
LB: loop body
LE: loop exit
PB: predicated region body
PF: predicated region fallthrough
CT: control target
= control target key end

     0   :  { %s169_s13 = smov 1   ;;  %s249_s0 = inlined_call_operand.vmem [shape: f32[24,128], index: 0, kind: input, shape index: {}]   ;;  %s250_s1 = inlined_call_operand.vmem [shape: f32[24,128], index: 1, kind: input, shape index: {}]   ;;  %s251_s2 = inlined_call_operand.hbm [shape: f32[1,1], index: 2, kind: output, shape index: {}]  }
   0x1   :  { %v189_v0 = vld [vmem:[%s250_s1] sm:$0xff]  ;;  %v201_v2 = vld [vmem:[%s249_s0 + $0x10] sm:$0xff] }
   0x2   :  { %v194_v1 = vld [vmem:[%s249_s0] sm:$0xff]  ;;  %33 = vrot.lane.b32.xlu1 %v189_v0, %s169_s13  ;;  %25 = vrot.lane.b32.xlu2 %v201_v2, %s169_s13 }
   0x3   :  { %21 = vrot.lane.b32.xlu0 %v194_v1, %s169_s13 }
   0x4   :  { %7 = vsyncpa [#allocation4], 0  ;;  %v207_v3 = vld [vmem:[%s250_s1 + $0x8] sm:$0xff]  ;;  %v217_v5 = vld [vmem:[%s250_s1 + $0x10] sm:$0xff]  ;;  %v48_v6 = vlaneseq  ;;  %v60_v9 = vrot.slane %v189_v0, 7  ;;  %v45_v10 = vrot.slane %v194_v1, 7  ;;  %v18_v59 = vsub.f32 %v194_v1, %v189_v0 }
   0x5   :  { %v212_v4 = vld [vmem:[%s249_s0 + $0x8] sm:$0xff]  ;;  %v47_v11 = vrot.slane %v201_v2, 7  ;;  %v62_v12 = vrot.slane %v217_v5, 7  ;;  %v61_v13 = vrot.slane %v207_v3, 7  ;;  %s141_s22 = sshll.u32 %s251_s2, 4  ;;  %s170_s25 = smov [#allocation3]   ;;  %s142_s22 = int_to_ptr.hbm [resolvable:$true] %s141_s22 }
   0x6   :  { %v49_v8 = vshrl.u32 %v48_v6, 7  ;;  %v46_v14 = vrot.slane %v212_v4, 7  ;;  %v19_v63 = vsub.f32 %v212_v4, %v207_v3 }
   0x8   :  { %vm50_vm0 = vcmp.lt.s32.totalorder %v49_v8, 1  ;;  %v20_v8 = vsub.f32 %v201_v2, %v217_v5 }
   0x9   :  { %v65_v15 = vsel %vm50_vm0, %v62_v12, %v60_v9  ;;  %v53_v16 = vsel %vm50_vm0, %v47_v11, %v45_v10  ;;  %v63_v17 = vsel %vm50_vm0, %v61_v13, %v62_v12  ;;  %v51_v18 = vsel %vm50_vm0, %v46_v14, %v47_v11 }
   0xa   :  { %35 = vrot.lane.b32.xlu1 %v207_v3, %s169_s13  ;;  %37 = vrot.lane.b32.xlu2 %v217_v5, %s169_s13  ;;  %v66_v19 = vsub.f32 %v189_v0, %v65_v15  ;;  %v54_v20 = vsub.f32 %v194_v1, %v53_v16  ;;  %v68_v22 = vsub.f32 %v217_v5, %v63_v17 }
   0xb   :  { %23 = vrot.lane.b32.xlu0 %v212_v4, %s169_s13  ;;  %v56_v24 = vsub.f32 %v201_v2, %v51_v18  ;;  %v64_v25 = vsel %vm50_vm0, %v60_v9, %v61_v13  ;;  %v52_v26 = vsel %vm50_vm0, %v45_v10, %v46_v14  ;;  %v78_v11 = vmul.f32 %v18_v59, %v18_v59 }
   0xc   :  { %v69_v29 = vand.u32 2147483647, %v66_v19  ;;  %v57_v31 = vand.u32 2147483647, %v54_v20  ;;  %v67_v34 = vsub.f32 %v207_v3, %v64_v25  ;;  %v55_v35 = vsub.f32 %v212_v4, %v52_v26 }
   0xd   :  { %v71_v37 = vand.u32 2147483647, %v68_v22  ;;  %v59_v38 = vand.u32 2147483647, %v56_v24  ;;  %v79_v12 = vmul.f32 %v19_v63, %v19_v63  ;;  %v80_v14 = vmul.f32 %v20_v8, %v20_v8 }
   0xe   :  { %v75_v42 = vsub.f32 %v57_v31, %v69_v29  ;;  %v70_v44 = vand.u32 2147483647, %v67_v34  ;;  %v58_v45 = vand.u32 2147483647, %v55_v35 }
   0xf   :  { %v77_v47 = vsub.f32 %v59_v38, %v71_v37 }
  0x10   :  { %v84_v48 = vmul.f32 %v75_v42, %v75_v42  ;;  %v76_v54 = vsub.f32 %v58_v45, %v70_v44 }
  0x11   :  { %v86_v56 = vmul.f32 %v77_v47, %v77_v47 }
  0x12   :  { %v85_v62 = vmul.f32 %v76_v54, %v76_v54 }
  0x5c   :  { %v26_v7 = vpop.permute.xlu2 %25 }
  0x5d   :  { %v29_v23 = vsub.f32 %v201_v2, %v26_v7 }
  0x5f   :  { %v32_v36 = vand.u32 2147483647, %v29_v23 }
  0x64   :  { %v38_v21 = vpop.permute.xlu2 %37 }
  0x65   :  { %v41_v27 = vsub.f32 %v217_v5, %v38_v21 }
  0x67   :  { %v44_v41 = vand.u32 2147483647, %v41_v27 }
  0x69   :  { %v74_v46 = vsub.f32 %v32_v36, %v44_v41 }
  0x6b   :  { %v83_v55 = vmul.f32 %v74_v46, %v74_v46 }
  0x6d   :  { %v89_v6 = vadd.f32 %v86_v56, %v83_v55 }
  0x6f   :  { %v92_v15 = vmul.f32 0.8858132, %v89_v6 }
  0x74   :  { %v34_v28 = vpop.permute.xlu1 %33 }
  0x75   :  { %v22_v30 = vpop.permute.xlu0 %21  ;;  %v39_v32 = vsub.f32 %v189_v0, %v34_v28 }
  0x76   :  { %v27_v33 = vsub.f32 %v194_v1, %v22_v30  ;;  %v95_v1 = vadd.f32 %v92_v15, %v80_v14 }
  0x77   :  { %v42_v39 = vand.u32 2147483647, %v39_v32 }
  0x78   :  { %v30_v40 = vand.u32 2147483647, %v27_v33 }
  0x7a   :  { %v72_v43 = vsub.f32 %v30_v40, %v42_v39 }
  0x7c   :  { %v36_v49 = vpop.permute.xlu1 %35  ;;  %v81_v51 = vmul.f32 %v72_v43, %v72_v43 }
  0x7d   :  { %v24_v50 = vpop.permute.xlu0 %23  ;;  %v40_v52 = vsub.f32 %v207_v3, %v36_v49 }
  0x7e   :  { %v28_v53 = vsub.f32 %v212_v4, %v24_v50  ;;  %v87_v60 = vadd.f32 %v84_v48, %v81_v51 }
  0x7f   :  { %v43_v57 = vand.u32 2147483647, %v40_v52 }
  0x80   :  { %v31_v58 = vand.u32 2147483647, %v28_v53  ;;  %v90_v9 = vmul.f32 0.8858132, %v87_v60 }
  0x82   :  { %v73_v61 = vsub.f32 %v31_v58, %v43_v57  ;;  %v93_v16 = vadd.f32 %v90_v9, %v78_v11 }
  0x84   :  { %v82_v7 = vmul.f32 %v73_v61, %v73_v61 }
  0x86   :  { %v88_v10 = vadd.f32 %v85_v62, %v82_v7 }
  0x88   :  { %v91_v13 = vmul.f32 0.8858132, %v88_v10 }
  0x8a   :  { %v94_v0 = vadd.f32 %v91_v13, %v79_v12 }
  0x8c   :  { %v122_v17 = vadd.f32 %v94_v0, %v93_v16 }
  0x8e   :  { %v123_v18 = vadd.f32 %v122_v17, %v95_v1 }
  0x90   :  { %124 = vadd.xlane.f32.xlu0 %v123_v18 }
 0x103   :  { %v125_v19 = vpop.xlane.xlu0 %124 }
 0x104   :  { %v126_v3 = vrot.slane %v125_v19, 4 }
 0x106   :  { %v127_v4 = vadd.f32 %v126_v3, %v125_v19 }
 0x108   :  { %v128_v20 = vrot.slane %v127_v4, 2 }
 0x10a   :  { %v129_v21 = vadd.f32 %v128_v20, %v127_v4 }
 0x10c   :  { %v130_v22 = vrot.slane %v129_v21, 1 }
 0x10e   :  { %v131_v2 = vadd.f32 %v130_v22, %v129_v21 }
 0x110   :  { %151 = vpush %v131_v2 }
 0x141   :  { %s152_s23 = spop %151 }
 0x142   :  { %s133_s24 = smul.f32 0.001953125, %s152_s23 }
 0x144   :  { %135 = sst [smem:[#allocation3]] %s133_s24 }
 0x145   :  { %144 = dma.smem_to_hbm %s170_s25, 16, %s142_s22, [#allocation4]  }
 0x146   :  { %167 = dma.done.wait [#allocation4], 16  }
 0x147   :  { %168 = vsyncadd [#allocation4], 4294967280 }
 0x148   :  { %149 = sfence }
 0x149   :  { %150 = vsyncpa [#allocation4], 1 }

</bundles_post_ra>
